<compile_context>
chip_gen: v7x
topology: tpu7x:2x2x1
jax: 0.10.0
libtpu: 0.0.40
codegen_flags: <defaults>
</compile_context>

<pallas_src>
import functools

import jax
import jax.numpy as jnp
from jax import lax
from jax.experimental import pallas as pl
from jax.experimental.pallas import tpu as pltpu

WEIGHTING = 1.5          # nn.Module __init__ default
LANES = 128
MAX_TILE_ROWS = 2048     # 3 inputs x 2 bufs x 2048 x 128 x 4B = 6 MiB VMEM (f32)


def _confidnet_mse_kernel(conf_ref, ypred_ref, y_ref, out_ref, *,
                          weighting, valid_rows, tile_rows, needs_mask):
    """One (tile_rows, 128) tile -> one (8, 128) block of partial sums."""
    confidence = conf_ref[...].astype(jnp.float32)
    y_pred = ypred_ref[...].astype(jnp.float32)
    y = y_ref[...].astype(jnp.float32)

    # Exact PyTorch semantics: (y_pred > 0.5).float() != y  (soft targets included).
    pred_bin = jnp.where(y_pred > 0.5, jnp.float32(1.0), jnp.float32(0.0))
    diff = confidence - y_pred * y
    sq = diff * diff
    term = jnp.where(pred_bin != y, sq * jnp.float32(weighting), sq)

    def reduce_to_block(t):
        # (R, 128) -> (8, 128) partial sums; plain vreg adds, no RMW accumulator.
        r = t.shape[0]
        if r % 8 == 0:
            return jnp.sum(t.reshape(r // 8, 8, LANES), axis=0)
        # Small, sublane-unaligned single-tile case: put the lane sums in row 0.
        lane_sums = jnp.sum(t, axis=0, keepdims=True)                   # (1, 128)
        row_ids = lax.broadcasted_iota(jnp.int32, (8, LANES), 0)
        return jnp.where(row_ids == 0,
                         jnp.broadcast_to(lane_sums, (8, LANES)),
                         jnp.float32(0.0))

    if needs_mask:
        i = pl.program_id(0)
        last = pl.num_programs(0) - 1

        @pl.when(i != last)
        def _full():
            out_ref[...] = reduce_to_block(term)

        @pl.when(i == last)
        def _tail():
            row_ids = lax.broadcasted_iota(jnp.int32, term.shape, 0) + i * tile_rows
            out_ref[...] = reduce_to_block(
                jnp.where(row_ids < valid_rows, term, jnp.float32(0.0)))
    else:
        out_ref[...] = reduce_to_block(term)


def confidnet_mse_loss(confidence, y_pred, y, weighting=WEIGHTING):
    """Pallas implementation of ConfidNetMSELoss.forward((confidence, y_pred), y)."""
    if confidence.shape != y.shape or y_pred.shape != y.shape:
        raise ValueError("confidence, y_pred and y must share a shape")
    B = y.shape[0]
    total = y.size
    rem = total % LANES

    # Lane-dense flattening.  Free reshape when total is a lane multiple; only
    # ragged totals pad the flat tail (pad entries contribute exactly 0).
    def lane_dense(a):
        a = a.reshape(-1)
        if rem:
            a = jnp.pad(a, (0, LANES - rem))
        return a.reshape(-1, LANES)

    conf2, yp2, y2 = lane_dense(confidence), lane_dense(y_pred), lane_dense(y)
    rows = conf2.shape[0]

    # One full-array tile if it fits, otherwise pipelined 2048-row tiles.
    tile_rows = rows if rows <= MAX_TILE_ROWS else MAX_TILE_ROWS
    num_tiles = -(-rows // tile_rows)
    needs_mask = (rows % tile_rows) != 0      # ragged final tile -> in-kernel iota mask

    kernel = functools.partial(
        _confidnet_mse_kernel,
        weighting=float(weighting),
        valid_rows=rows,
        tile_rows=tile_rows,
        needs_mask=needs_mask,
    )

    partials = pl.pallas_call(
        kernel,
        out_shape=jax.ShapeDtypeStruct((num_tiles * 8, LANES), jnp.float32),
        grid_spec=pltpu.PrefetchScalarGridSpec(
            num_scalar_prefetch=0,
            grid=(num_tiles,),
            in_specs=[
                pl.BlockSpec((tile_rows, LANES), lambda i: (i, 0)),  # confidence
                pl.BlockSpec((tile_rows, LANES), lambda i: (i, 0)),  # y_pred
                pl.BlockSpec((tile_rows, LANES), lambda i: (i, 0)),  # y
            ],
            out_specs=pl.BlockSpec((8, LANES), lambda i: (i, 0)),
        ),
        compiler_params=pltpu.CompilerParams(
            dimension_semantics=("parallel",),   # independent tiles: both TCs on v7x
        ),
    )(conf2, yp2, y2)

    # Tiny (num_tiles*8, 128) final reduce + mean-over-batch scale in plain XLA.
    return jnp.sum(partials) / jnp.float32(B)


def _reference(confidence, y_pred, y, weighting=WEIGHTING):
    confidence = confidence.astype(jnp.float32)
    y_pred = y_pred.astype(jnp.float32)
    y = y.astype(jnp.float32)
    pred_bin = (y_pred > 0.5).astype(jnp.float32)
    weights = jnp.where(pred_bin != y, jnp.float32(weighting), jnp.float32(1.0))
    return jnp.mean(jnp.sum(weights * (confidence - y_pred * y) ** 2, axis=1))


if __name__ == "__main__":
    key = jax.random.PRNGKey(0)

    def make_inputs(k, B, C, dtype=jnp.float32):
        k1, k2, k3 = jax.random.split(k, 3)
        confidence = jax.random.uniform(k1, (B, C)).astype(dtype)   # predicted confidence
        y_pred = jax.random.uniform(k2, (B, C)).astype(dtype)       # predicted class probs
        y = (jax.random.uniform(k3, (B, C)) > 0.5).astype(dtype)    # binary targets
        return confidence, y_pred, y

    cases = [
        ("small_aligned", 8, 32, jnp.float32),     # single tile, B*C % 128 == 0
        ("ragged_tail",   6, 37, jnp.float32),     # B*C % 128 != 0 -> pad fallback
        ("bf16_inputs",  16, 128, jnp.bfloat16),   # bf16 in HBM, f32 math in-kernel
        ("multi_tile",  512, 600, jnp.float32),    # 2400 rows -> 2 tiles + masked tail
    ]
    keys = jax.random.split(key, len(cases))
    for (name, B, C, dtype), k in zip(cases, keys):
        conf, yp, y = make_inputs(k, B, C, dtype)
        loss = confidnet_mse_loss(conf, yp, y)
        jax.block_until_ready(loss)
        ref = _reference(conf, yp, y)
        assert jnp.allclose(loss, ref, rtol=1e-5, atol=1e-5), (name, loss, ref)

    print("KERNEL_OK")
</pallas_src>

<mosaic_0001>
module attributes {stable_mosaic.version = 11 : i64} {
  func.func @_confidnet_mse_kernel(%arg0: i32, %arg1: memref<2x128xf32, #tpu.memory_space<vmem>>, %arg2: memref<2x128xf32, #tpu.memory_space<vmem>>, %arg3: memref<2x128xf32, #tpu.memory_space<vmem>>, %arg4: memref<8x128xf32, #tpu.memory_space<vmem>>) attributes {dimension_semantics = [#tpu.dimension_semantics<parallel>], iteration_bounds = array<i64: 1>, scalar_prefetch = 0 : i64, scratch_operands = 0 : i64, tpu.core_type = #tpu.core_type<tc>, window_params = [{transform_indices = @transform_0, window_bounds = array<i64: 2, 128>}, {transform_indices = @transform_1, window_bounds = array<i64: 2, 128>}, {transform_indices = @transform_2, window_bounds = array<i64: 2, 128>}, {transform_indices = @transform_3, window_bounds = array<i64: 8, 128>}]} {
    %c0 = arith.constant 0 : index
    %c0_0 = arith.constant 0 : index
    %0 = vector.load %arg1[%c0, %c0_0] : memref<2x128xf32, #tpu.memory_space<vmem>>, vector<2x128xf32>
    %c0_1 = arith.constant 0 : index
    %c0_2 = arith.constant 0 : index
    %1 = vector.load %arg2[%c0_1, %c0_2] : memref<2x128xf32, #tpu.memory_space<vmem>>, vector<2x128xf32>
    %c0_3 = arith.constant 0 : index
    %c0_4 = arith.constant 0 : index
    %2 = vector.load %arg3[%c0_3, %c0_4] : memref<2x128xf32, #tpu.memory_space<vmem>>, vector<2x128xf32>
    %cst = arith.constant 5.000000e-01 : f32
    %3 = vector.broadcast %cst : f32 to vector<2x128xf32>
    %4 = arith.cmpf ogt, %1, %3 : vector<2x128xf32>
    %cst_5 = arith.constant 1.000000e+00 : f32
    %cst_6 = arith.constant 0.000000e+00 : f32
    %5 = vector.broadcast %cst_5 : f32 to vector<2x128xf32>
    %6 = vector.broadcast %cst_6 : f32 to vector<2x128xf32>
    %7 = arith.select %4, %5, %6 : vector<2x128xi1>, vector<2x128xf32>
    %8 = arith.mulf %1, %2 : vector<2x128xf32>
    %9 = arith.subf %0, %8 : vector<2x128xf32>
    %10 = arith.mulf %9, %9 : vector<2x128xf32>
    %11 = arith.cmpf one, %7, %2 : vector<2x128xf32>
    %cst_7 = arith.constant 1.500000e+00 : f32
    %12 = vector.broadcast %cst_7 : f32 to vector<2x128xf32>
    %13 = arith.mulf %10, %12 : vector<2x128xf32>
    %14 = arith.select %11, %13, %10 : vector<2x128xi1>, vector<2x128xf32>
    %cst_8 = arith.constant dense<0.000000e+00> : vector<128xf32>
    %15 = vector.multi_reduction <add>, %14, %cst_8 [0] : vector<2x128xf32> to vector<128xf32>
    %16 = vector.shape_cast %15 : vector<128xf32> to vector<1x128xf32>
    %17 = tpu.iota {dimensions = array<i32: 0>} : vector<8x128xi32>
    %c0_i32 = arith.constant 0 : i32
    %18 = vector.broadcast %c0_i32 : i32 to vector<8x128xi32>
    %19 = arith.cmpi eq, %17, %18 : vector<8x128xi32>
    %20 = vector.shape_cast %16 : vector<1x128xf32> to vector<1x128xf32>
    %21 = vector.broadcast %20 : vector<1x128xf32> to vector<8x128xf32>
    %cst_9 = arith.constant 0.000000e+00 : f32
    %22 = vector.broadcast %cst_9 : f32 to vector<8x128xf32>
    %23 = arith.select %19, %21, %22 : vector<8x128xi1>, vector<8x128xf32>
    %c0_10 = arith.constant 0 : index
    %c0_11 = arith.constant 0 : index
    %24 = vector.load %arg4[%c0_10, %c0_11] : memref<8x128xf32, #tpu.memory_space<vmem>>, vector<8x128xf32>
    tpu.vector_store %arg4[%c0_10, %c0_11], %23 {strides = array<i32>} : memref<8x128xf32, #tpu.memory_space<vmem>>, vector<8x128xf32>,
    return
  }
  func.func @transform_0(%arg0: i32) -> (i32, i32) {
    %c0_i32 = arith.constant 0 : i32
    %c0_i32_0 = arith.constant 0 : i32
    return %arg0, %c0_i32 : i32, i32
  }
  func.func @transform_1(%arg0: i32) -> (i32, i32) {
    %c0_i32 = arith.constant 0 : i32
    %c0_i32_0 = arith.constant 0 : i32
    return %arg0, %c0_i32 : i32, i32
  }
  func.func @transform_2(%arg0: i32) -> (i32, i32) {
    %c0_i32 = arith.constant 0 : i32
    %c0_i32_0 = arith.constant 0 : i32
    return %arg0, %c0_i32 : i32, i32
  }
  func.func @transform_3(%arg0: i32) -> (i32, i32) {
    %c0_i32 = arith.constant 0 : i32
    %c0_i32_0 = arith.constant 0 : i32
    return %arg0, %c0_i32 : i32, i32
  }
}

</mosaic_0001>

<bundles_post_ra>
// kernel: tpu_custom_call.1
= control target key start
LH: loop header
LB: loop body
LE: loop exit
PB: predicated region body
PF: predicated region fallthrough
CT: control target
= control target key end

     0   :  { %8 = vsyncpa [#allocation3], 0  ;;  %s170_s0 = inlined_call_operand.hbm [shape: f32[2,128], index: 0, kind: input, shape index: {}]   ;;  %s171_s1 = inlined_call_operand.vmem [shape: f32[2,128], index: 1, kind: input, shape index: {}]   ;;  %s172_s2 = inlined_call_operand.vmem [shape: f32[2,128], index: 2, kind: input, shape index: {}]   ;;  %s173_s3 = inlined_call_operand.hbm [shape: f32[8,128], index: 3, kind: output, shape index: {}]  }
   0x1   :  { %9 = vsyncpa [#allocation4], 0  ;;  %s117_s12 = smov [#allocation2]   ;;  %s69_s16 = scalar_lea.hbm %s170_s0, 32 }
   0x2   :  { %s16_s13 = sshll.u32 %s117_s12, 4  ;;  %p70_p0 = scmp.ne.s32.totalorder %s170_s0, %s69_s16  ;;  %s17_s13 = int_to_ptr.vmem [resolvable:$true] %s16_s13 }
   0x3   :  { %p73_p1 = scmp.lt.u32.totalorder %s69_s16, %s170_s0 }
   0x5   :  { %p75_p2 = pnand %p73_p1, %p70_p0 }
   0x7   :  { %78 = shalt.err (!%p75_p2)
}
   0x8   :  { %s79_s21 = scalar_lea.vmem %s17_s13, 32  ;;  %p84_p4 = scmp.lt.s32.totalorder %s17_s13, %s17_s13 }
   0x9   :  { %p80_p3 = scmp.ne.s32.totalorder %s17_s13, %s79_s21  ;;  %p85_p5 = scmp.lt.s32.totalorder %s79_s21, %s79_s21 }
   0xb   :  { %p86_p6 = por %p85_p5, %p84_p4 }
   0xd   :  { %p87_p7 = pnand %p86_p6, %p80_p3 }
   0xf   :  { %90 = shalt.err (!%p87_p7)
}
  0x10   :  { %19 = dma.hbm_to_vmem [thread:$0]  %s170_s0, 32, %s17_s13, [#allocation3]  }
  0x11   :  { %113 = dma.done.wait [#allocation3], 32  }
  0x12   :  { %114 = vsyncadd [#allocation3], 4294967264  ;;  %v27_v0 = vld [vmem:[#allocation2] sm:$0x3]  ;;  %v118_v4 = vmov 0.0   ;;  %vm38_vm2 = vcmask 1041408   ;;  %v46_v12 = vlaneseq }
  0x13   :  { %v28_v1 = vld [vmem:[%s171_s1] sm:$0x3]  ;;  %s119_s0 = smov [#allocation5]  }
  0x14   :  { %v29_v2 = vld [vmem:[%s172_s2] sm:$0x3]  ;;  %vm30_vm0 = vcmp.gt.f32.partialorder %v28_v1, 0.5  ;;  %v47_v15 = vshrl.u32 %v46_v12, 7  ;;  %s57_s1 = sshll.u32 %s119_s0, 4  ;;  %s58_s1 = int_to_ptr.vmem [resolvable:$true] %s57_s1 }
  0x15   :  { %v32_v3 = vmul.f32 %v29_v2, %v28_v1  ;;  %v31_v5 = vsel %vm30_vm0, 1.0, %v118_v4  ;;  %s91_s2 = scalar_lea.vmem %s58_s1, 128  ;;  %p96_p9 = scmp.lt.s32.totalorder %s58_s1, %s58_s1 }
  0x16   :  { %vm35_vm1 = vcmp.ne.f32.partialorder %v31_v5, %v29_v2  ;;  %vm48_vm3 = vcmp.eq.s32.totalorder %v47_v15, 0  ;;  %p92_p8 = scmp.ne.s32.totalorder %s58_s1, %s91_s2  ;;  %p97_p10 = scmp.lt.s32.totalorder %s91_s2, %s91_s2 }
  0x17   :  { %v33_v6 = vsub.f32 %v27_v0, %v32_v3 }
  0x18   :  { %p98_p11 = por %p97_p10, %p96_p9 }
  0x19   :  { %v34_v7 = vmul.f32 %v33_v6, %v33_v6 }
  0x1a   :  { %p99_p12 = pnand %p98_p11, %p92_p8 }
  0x1b   :  { %v36_v8 = vmul.f32 1.5, %v34_v7 }
  0x1d   :  { %v37_v9 = vsel %vm35_vm1, %v36_v8, %v34_v7 }
  0x1e   :  { %v39_v10 = vsel %vm38_vm2, %v37_v9, 0.0 }
  0x1f   :  { %v40_v11 = vrot.slane %v39_v10, 4 }
  0x21   :  { %v41_v13 = vadd.f32 %v40_v11, %v39_v10 }
  0x23   :  { %v42_v14 = vrot.slane %v41_v13, 2 }
  0x25   :  { %v43_v16 = vadd.f32 %v42_v14, %v41_v13 }
  0x27   :  { %v44_v17 = vrot.slane %v43_v16, 1 }
  0x29   :  { %v45_v18 = vadd.f32 %v44_v17, %v43_v16 }
  0x2b   :  { %v49_v19 = vsel %vm48_vm3, %v45_v18, 0.0 }
  0x2c   :  { %50 = vst [vmem:[#allocation5] sm:$0xff] %v49_v19 }
  0x2d   :  { %102 = shalt.err (!%p99_p12)
}
  0x2e   :  { %s103_s30 = scalar_lea.hbm %s173_s3, 128 }
  0x2f   :  { %p104_p13 = scmp.ne.s32.totalorder %s173_s3, %s103_s30  ;;  %p107_p0 = scmp.lt.u32.totalorder %s103_s30, %s173_s3 }
  0x31   :  { %p109_p1 = pnand %p107_p0, %p104_p13 }
  0x33   :  { %112 = shalt.err (!%p109_p1)
}
  0x34   :  { %60 = dma.vmem_to_hbm [thread:$0]  %s58_s1, 128, %s173_s3, [#allocation4]  }
  0x35   :  { %115 = dma.done.wait [#allocation4], 128  }
  0x36   :  { %116 = vsyncadd [#allocation4], 4294967168 }
  0x37   :  { %64 = vsyncpa [#allocation3], 1 }
  0x38   :  { %65 = vsyncpa [#allocation4], 1 }

</bundles_post_ra>
